<compile_context>
chip_gen: v7x
topology: tpu7x:2x2x1
jax: 0.10.0
libtpu: 0.0.40
codegen_flags: <defaults>
</compile_context>

<pallas_src>
import functools

import jax
import jax.numpy as jnp
from jax.experimental import pallas as pl
from jax.experimental.pallas import tpu as pltpu


# ---------------------------------------------------------------------------
# Fused kernel: gather stride-phase planes + matmul + bias for one image.
#   x_ref: (1, n_planes*Cin, R*Wo)  bf16  stride-phase planes (flat spatial)
#   w_ref: (tco, 9*Cin)             bf16  (kh, kw, ci)-major weight columns
#   b_ref: (tco, 1)                 f32   bias
#   o_ref: (1, tco, Ho*Wo)          f32   output, NC(HW) layout (lane-dense)
# ---------------------------------------------------------------------------
def _fused_conv_kernel(x_ref, w_ref, b_ref, o_ref, *, groups, h_out, w_out):
    hw = h_out * w_out
    acc = None
    # Each "group" covers all taps sharing the same row offset `a` inside the
    # phase planes; its patch slab is a single contiguous 2-D slice, so no
    # in-kernel reshape/relayout is needed.
    for (k_off, k_width, sp_off) in groups:
        xs = x_ref[0, 0:k_width, sp_off:sp_off + hw]           # (k_width, Ho*Wo)
        wk = w_ref[:, k_off:k_off + k_width]                   # (tco,    k_width)
        part = jnp.dot(wk, xs, preferred_element_type=jnp.float32)
        acc = part if acc is None else acc + part
    o_ref[0] = (acc + b_ref[...]).astype(o_ref.dtype)


# ---------------------------------------------------------------------------
# DownsamplerBlock forward (== torch.nn.Conv2d(Cin, Cout, 3, stride=factor,
# padding=padding)(x)), bf16 operands / f32 accumulation on the MXU.
# ---------------------------------------------------------------------------
def downsampler_block_forward(x_nchw, weight, bias, factor=2, padding=1,
                              compute_dtype=jnp.bfloat16):
    N, C, H, W = x_nchw.shape
    O = weight.shape[0]
    kH = kW = 3
    s = int(factor)

    Ho = (H + 2 * padding - kH) // s + 1
    Wo = (W + 2 * padding - kW) // s + 1
    a_max = (kH - 1) // s            # max row offset used inside a phase plane
    n_p = min(s, kH)                 # number of row phases actually used
    R = Ho + a_max                   # rows kept per phase plane

    Hp = H + 2 * padding
    Wp = W + 2 * padding
    extra_h = max(0, s * (R - 1) + n_p - Hp)   # keep phase slicing in-bounds

    # --- glue: cast first, zero-pad, stride-phase decomposition (NCHW kept) --
    xb = x_nchw.astype(compute_dtype)
    xp = jnp.pad(xb, ((0, 0), (0, 0),
                      (padding, padding + extra_h),
                      (padding, padding)))
    # plane (p, kw): P[ci, i, wo] = xp[ci, s*i + p, s*wo + kw], flattened spatially
    planes = []
    for p in range(n_p):
        for kw in range(kW):
            plane = xp[:, :, p::s, kw::s][:, :, :R, :Wo]       # (N, C, R, Wo)
            planes.append(plane.reshape(N, C, R * Wo))
    phases = jnp.concatenate(planes, axis=1)                   # (N, n_p*3*C, R*Wo)

    # weights: (Cout, Cin, 3, 3) -> (Cout, 9*Cin), (kh, kw, ci)-major columns
    w2 = jnp.transpose(weight, (0, 2, 3, 1)).reshape(O, kH * kW * C)
    w2 = w2.astype(compute_dtype)
    b2 = bias.astype(jnp.float32).reshape(O, 1)

    # per-row-offset groups: (weight col offset, K width, flat spatial offset)
    groups = []
    for a in range(a_max + 1):
        pcount = min(n_p, kH - a * s)
        groups.append((a * s * kW * C, pcount * kW * C, a * Wo))

    # Cout tiling (single tile for typical small/medium Cout -> no padding)
    if O > 256 and O % 256 == 0:
        tco = 256
    else:
        tco = O
    n_co = O // tco

    PH_C = n_p * kW * C
    HW = Ho * Wo
    RW = R * Wo
    K9 = kH * kW * C

    kernel = functools.partial(_fused_conv_kernel, groups=tuple(groups),
                               h_out=Ho, w_out=Wo)

    ib = jnp.dtype(compute_dtype).itemsize
    x_blk = PH_C * RW * ib
    o_blk = tco * HW * 4
    w_blk = tco * K9 * ib
    vmem_need = 2 * (x_blk + o_blk) + 2 * (w_blk + tco * 4) + (8 << 20)
    try:
        vmem_cap = int(pltpu.get_tpu_info().vmem_capacity_bytes)
    except Exception:
        vmem_cap = 64 << 20          # conservative (v7x per-TC VMEM)
    vmem_limit = int(min(max(vmem_need, 32 << 20), (vmem_cap * 3) // 4))

    cost = pl.CostEstimate(
        flops=2 * N * O * K9 * HW,
        transcendentals=0,
        bytes_accessed=(N * PH_C * RW * ib + O * K9 * ib + O * 4
                        + N * O * HW * 4),
    )

    out_flat = pl.pallas_call(
        kernel,
        out_shape=jax.ShapeDtypeStruct((N, O, HW), jnp.float32),
        grid_spec=pltpu.PrefetchScalarGridSpec(
            num_scalar_prefetch=0,
            grid=(N, n_co),
            in_specs=[
                pl.BlockSpec((1, PH_C, RW), lambda n, j: (n, 0, 0)),
                pl.BlockSpec((tco, K9), lambda n, j: (j, 0)),
                pl.BlockSpec((tco, 1), lambda n, j: (j, 0)),
            ],
            out_specs=pl.BlockSpec((1, tco, HW), lambda n, j: (n, j, 0)),
        ),
        compiler_params=pltpu.CompilerParams(
            dimension_semantics=("parallel", "parallel"),
            vmem_limit_bytes=vmem_limit,
        ),
        cost_estimate=cost,
    )(phases, w2, b2)

    # Free (metadata-only) reshape back to NCHW.
    out = out_flat.reshape(N, O, Ho, Wo)
    return out.astype(x_nchw.dtype)


# ---------------------------------------------------------------------------
# Main
# ---------------------------------------------------------------------------
if __name__ == "__main__":
    key = jax.random.PRNGKey(0)
    k_x, k_w, k_b = jax.random.split(key, 3)

    N, Cin, H, W = 2, 4, 16, 16
    Cout, factor = 8, 2

    x = jax.random.normal(k_x, (N, Cin, H, W), dtype=jnp.float32)
    # Deterministic param init (mimicking Conv2d's uniform fan-in scale).
    fan_in = Cin * 3 * 3
    bound = 1.0 / (fan_in ** 0.5)
    weight = jax.random.uniform(k_w, (Cout, Cin, 3, 3), jnp.float32,
                                minval=-bound, maxval=bound)
    bias = jax.random.uniform(k_b, (Cout,), jnp.float32,
                              minval=-bound, maxval=bound)

    out = downsampler_block_forward(x, weight, bias, factor=factor, padding=1)
    out = jax.block_until_ready(out)
    assert out.shape == (N, Cout, H // factor, W // factor), out.shape

    # Tight check: reference with the same bf16-rounded operands and f32
    # accumulation (exactly the kernel's math, up to accumulation order).
    xb = x.astype(jnp.bfloat16).astype(jnp.float32)
    wb = weight.astype(jnp.bfloat16).astype(jnp.float32)
    ref_bf16 = jax.lax.conv_general_dilated(
        xb, wb, window_strides=(factor, factor), padding=((1, 1), (1, 1)),
        dimension_numbers=("NCHW", "OIHW", "NCHW"),
    ) + bias.reshape(1, Cout, 1, 1)
    ref_bf16 = jax.block_until_ready(ref_bf16)
    assert jnp.allclose(out, ref_bf16, atol=2e-3, rtol=2e-3), \
        float(jnp.max(jnp.abs(out - ref_bf16)))

    # Loose sanity check against the full-f32 conv (PyTorch module semantics).
    ref_f32 = jax.lax.conv_general_dilated(
        x, weight, window_strides=(factor, factor), padding=((1, 1), (1, 1)),
        dimension_numbers=("NCHW", "OIHW", "NCHW"),
    ) + bias.reshape(1, Cout, 1, 1)
    assert jnp.allclose(out, ref_f32, atol=5e-2, rtol=5e-2), \
        float(jnp.max(jnp.abs(out - ref_f32)))

    print("KERNEL_OK")
</pallas_src>

<mosaic_0001>
module attributes {stable_mosaic.version = 11 : i64} {
  func.func @_fused_conv_kernel(%arg0: i32, %arg1: i32, %arg2: memref<1x24x72xbf16, #tpu.memory_space<vmem>>, %arg3: memref<8x36xbf16, #tpu.memory_space<vmem>>, %arg4: memref<8x1xf32, #tpu.memory_space<vmem>>, %arg5: memref<1x8x64xf32, #tpu.memory_space<vmem>>) attributes {dimension_semantics = [#tpu.dimension_semantics<parallel>, #tpu.dimension_semantics<parallel>], iteration_bounds = array<i64: 2, 1>, scalar_prefetch = 0 : i64, scratch_operands = 0 : i64, tpu.core_type = #tpu.core_type<tc>, window_params = [{transform_indices = @transform_0, window_bounds = array<i64: 1, 24, 72>}, {transform_indices = @transform_1, window_bounds = array<i64: 8, 36>}, {transform_indices = @transform_2, window_bounds = array<i64: 8, 1>}, {transform_indices = @transform_3, window_bounds = array<i64: 1, 8, 64>}]} {
    %c0 = arith.constant 0 : index
    %c0_0 = arith.constant 0 : index
    %c0_1 = arith.constant 0 : index
    %0 = vector.load %arg2[%c0, %c0_0, %c0_1] : memref<1x24x72xbf16, #tpu.memory_space<vmem>>, vector<1x24x64xbf16>
    %1 = vector.shape_cast %0 : vector<1x24x64xbf16> to vector<24x64xbf16>
    %c0_2 = arith.constant 0 : index
    %c0_3 = arith.constant 0 : index
    %2 = vector.load %arg3[%c0_2, %c0_3] : memref<8x36xbf16, #tpu.memory_space<vmem>>, vector<8x24xbf16>
    %cst = arith.constant dense<0.000000e+00> : vector<8x64xf32>
    %3 = tpu.matmul %2, %1, %cst {dimension_numbers = #tpu.dot_dimension_numbers<[1], [0], [0], [1], [0, 0, 1, 1], [], []>} : vector<8x24xbf16>, vector<24x64xbf16>, vector<8x64xf32> -> vector<8x64xf32>
    %c0_4 = arith.constant 0 : index
    %c0_5 = arith.constant 0 : index
    %c8 = arith.constant 8 : index
    %4 = vector.load %arg2[%c0_4, %c0_5, %c8] : memref<1x24x72xbf16, #tpu.memory_space<vmem>>, vector<1x12x64xbf16>
    %5 = vector.shape_cast %4 : vector<1x12x64xbf16> to vector<12x64xbf16>
    %c0_6 = arith.constant 0 : index
    %c24 = arith.constant 24 : index
    %6 = vector.load %arg3[%c0_6, %c24] : memref<8x36xbf16, #tpu.memory_space<vmem>>, vector<8x12xbf16>
    %cst_7 = arith.constant dense<0.000000e+00> : vector<8x64xf32>
    %7 = tpu.matmul %6, %5, %cst_7 {dimension_numbers = #tpu.dot_dimension_numbers<[1], [0], [0], [1], [0, 0, 1, 1], [], []>} : vector<8x12xbf16>, vector<12x64xbf16>, vector<8x64xf32> -> vector<8x64xf32>
    %8 = arith.addf %3, %7 : vector<8x64xf32>
    %c0_8 = arith.constant 0 : index
    %c0_9 = arith.constant 0 : index
    %9 = vector.load %arg4[%c0_8, %c0_9] : memref<8x1xf32, #tpu.memory_space<vmem>>, vector<8x1xf32>
    %10 = vector.broadcast %9 : vector<8x1xf32> to vector<8x64xf32>
    %11 = arith.addf %8, %10 : vector<8x64xf32>
    %c0_10 = arith.constant 0 : index
    %c0_11 = arith.constant 0 : index
    %c0_12 = arith.constant 0 : index
    %12 = vector.load %arg5[%c0_10, %c0_11, %c0_12] : memref<1x8x64xf32, #tpu.memory_space<vmem>>, vector<1x8x64xf32>
    %13 = vector.shape_cast %12 : vector<1x8x64xf32> to vector<8x64xf32>
    %14 = vector.shape_cast %11 : vector<8x64xf32> to vector<1x8x64xf32>
    tpu.vector_store %arg5[%c0_10, %c0_11, %c0_12], %14 {strides = array<i32>} : memref<1x8x64xf32, #tpu.memory_space<vmem>>, vector<1x8x64xf32>,
    return
  }
  func.func @transform_0(%arg0: i32, %arg1: i32) -> (i32, i32, i32) {
    %c0_i32 = arith.constant 0 : i32
    %c0_i32_0 = arith.constant 0 : i32
    %c0_i32_1 = arith.constant 0 : i32
    return %arg0, %c0_i32, %c0_i32_0 : i32, i32, i32
  }
  func.func @transform_1(%arg0: i32, %arg1: i32) -> (i32, i32) {
    %c0_i32 = arith.constant 0 : i32
    %c0_i32_0 = arith.constant 0 : i32
    return %arg1, %c0_i32 : i32, i32
  }
  func.func @transform_2(%arg0: i32, %arg1: i32) -> (i32, i32) {
    %c0_i32 = arith.constant 0 : i32
    %c0_i32_0 = arith.constant 0 : i32
    return %arg1, %c0_i32 : i32, i32
  }
  func.func @transform_3(%arg0: i32, %arg1: i32) -> (i32, i32, i32) {
    %c0_i32 = arith.constant 0 : i32
    %c0_i32_0 = arith.constant 0 : i32
    return %arg0, %arg1, %c0_i32 : i32, i32, i32
  }
}

</mosaic_0001>

<bundles_post_ra>
// kernel: tpu_custom_call.1
= control target key start
LH: loop header
LB: loop body
LE: loop exit
PB: predicated region body
PF: predicated region fallthrough
CT: control target
= control target key end

     0   :  { %8 = vsyncpa [#allocation3], 0  ;;  %s930_s0 = inlined_call_operand.hbm [shape: bf16[2,24,72], index: 0, kind: input, shape index: {}]   ;;  %s931_s1 = inlined_call_operand.vmem [shape: bf16[8,36], index: 1, kind: input, shape index: {}]   ;;  %s932_s2 = inlined_call_operand.vmem [shape: f32[8,1], index: 2, kind: input, shape index: {}]   ;;  %s933_s3 = inlined_call_operand.hbm [shape: f32[2,8,64], index: 3, kind: output, shape index: {}]  }
   0x1   :  { %10 = vsyncpa [#allocation3 + $0x1], 0 }
   0x2   :  { %11 = vsyncpa [#allocation4], 0 }
   0x3   :  { %13 = vsyncpa [#allocation4 + $0x1], 0  ;;  %s750_s12 = smov 0   ;;  %s752_s13 = smov 0  }
   0x4   :  { %s754_s14 = smov 0   ;;  %s756_s15 = smov 0  }
   0x5   :  { %s758_s16 = smov 0   ;;  %s760_s17 = smov 0  }
   0x6 LB: > { %s491_s18 = sadd.s32 4294967295, %s719_s17   ;;  %s492_s19 = sadd.s32 4294967294, %s719_s17   ;;  %s719_s17 = sphi %s760_s17, %s19_s17   ;;  %s715_s16 = sphi %s758_s16, %s948_s16   ;;  %s711_s15 = sphi %s756_s15, %s947_s15   ;;  %s707_s14 = sphi %s754_s14, %s946_s14   ;;  %s703_s13 = sphi %s752_s13, %s945_s13   ;;  %s699_s12 = sphi %s750_s12, %s944_s12  }
   0x7   : > { %s31_s20 = sadd.s32 1, %s715_s16  ;;  %s38_s21 = sadd.s32 1, %s707_s14 }
   0x8   : > { %p33_p0 = scmp.ge.s32.totalorder %s31_s20, 2  ;;  %p45_p1 = scmp.ne.s32.totalorder %s707_s14, %s703_s13 }
   0x9   : > { %p46_p2 = scmp.eq.s32.totalorder %s719_s17, 0  ;;  %p51_p3 = scmp.ne.s32.totalorder %s703_s13, %s699_s12 }
   0xa   : > { %s950_s20 = smov (%p33_p0, %s31_s20), 0  ;;  %p52_p5 = scmp.eq.s32.totalorder %s491_s18, 0 }
   0xb   : > { %p791_p4 = por %p46_p2, %p45_p1  ;;  %s35_s23 = ssub.s32 %s715_s16, %s950_s20 }
   0xc   : > { %p129_p6 = scmp.eq.s32.totalorder %s491_s18, 1  ;;  %p36_p7 = scmp.eq.s32.totalorder %s35_s23, 0 }
   0xd   : > { %p797_p8 = por %p52_p5, %p51_p3  ;;  %p135_p10 = scmp.eq.s32.totalorder %s492_s19, 1 }
   0xe   : > { %p801_p9 = por %p129_p6, %p45_p1  ;;  %p544_p13 = scmp.lt.s32.totalorder %s719_s17, 2 }
   0xf   : > { %s806_s26 = scalar_select %p36_p7, %s707_s14, %s38_s21  }
  0x10   : > { %s937_s25 = scalar_select %p801_p9, 1, 0 }
  0x11   : > { %p808_p11 = por %p135_p10, %p51_p3  ;;  %s169_s28 = sand.u32 1, %s707_s14  }
  0x12   : > { %s529_s29 = smul.u32 12, %s169_s28  ;;  %p818_p0 = pnand %p544_p13, %p791_p4 }
  0x13   : > { %s938_s27 = scalar_select %p808_p11, 1, 0 }
  0x14   : > { %s530_s30 = smul.u32 192, %s715_s16  ;;  %s173_s8 = scalar_lea.vmem [#allocation2], %s529_s29 }
  0x15   : > { %s180_s9 = sshll.u32 %s173_s8, 4  ;;  %s830_s10 = scalar_lea.sflag [#allocation3], %s169_s28  ;;  %s827_s9 = int_to_ptr.vmem [resolvable:$true] %s180_s9 }
  0x16   : > { %s825_s7 = scalar_lea.hbm %s930_s0, %s530_s30  ;;  %p609_p3 = pneg %p818_p0 }
  0x17   : > { %s607_s11 = scalar_lea.hbm %s825_s7, 192  ;;  %s612_s21 = scalar_lea.hbm %s930_s0, 384 }
  0x18   : > { %p608_p2 = scmp.ne.s32.totalorder %s825_s7, %s607_s11  ;;  %p613_p6 = scmp.lt.u32.totalorder %s825_s7, %s930_s0 }
  0x19   : > { %p614_p7 = scmp.lt.u32.totalorder %s612_s21, %s607_s11  ;;  %p616_p13 = scmp.lt.u32.totalorder %s607_s11, %s825_s7 }
  0x1a   : > { %p610_p4 = pnand %p609_p3, %p608_p2 }
  0x1b   : > { %p615_p10 = por %p614_p7, %p613_p6 }
  0x1c   : > { %p611_p5 = pneg %p610_p4 }
  0x1d   : > { %p617_p12 = por %p616_p13, %p615_p10 }
  0x1f   : > { %p618_p1 = pnand %p617_p12, %p611_p5 }
  0x21   : > { %621 = shalt.err (!%p618_p1)
}
  0x22   : > { %s622_s28 = scalar_lea.vmem %s827_s9, 192  ;;  %s721_s29 = smov [#allocation2]  }
  0x23   : > { %p623_p2 = scmp.ne.s32.totalorder %s827_s9, %s622_s28  ;;  %s627_s30 = sshll.u32 %s721_s29, 4  ;;  %s628_s30 = int_to_ptr.vmem [resolvable:$false] %s627_s30 }
  0x24   : > { %s629_s5 = scalar_lea.vmem %s628_s30, 384  ;;  %p630_p9 = scmp.lt.s32.totalorder %s827_s9, %s628_s30 }
  0x25   : > { %p625_p4 = pnand %p623_p2, %p609_p3  ;;  %p631_p6 = scmp.lt.s32.totalorder %s629_s5, %s622_s28 }
  0x27   : > { %p626_p11 = pneg %p625_p4  ;;  %p632_p7 = por %p631_p6, %p630_p9 }
  0x29   : > { %p633_p10 = pnand %p632_p7, %p626_p11 }
  0x2b   : > { %636 = shalt.err (!%p633_p10)
}
  0x2c   : > { %s722_s6 = smov 64   ;;  %s723_s8 = smov 4  }
  0x2d   : > { %539 = dma.hbm_to_vmem [thread:$0]  (!%p818_p0), %s825_s7, 192, %s827_s9, %s830_s10, %s722_s6, %s722_s6, %s723_s8  }
  0x2e   : > { %p188_p12 = scmp.lt.s32.totalorder %s719_s17, 3  ;;  %p940_p1 = scmp.ge.s32.totalorder %s719_s17, 1 }
  0x30   : > { %p189_p3 = pnand %p940_p1, %p188_p12 }
  0x31   : > { %s862_s11 = sand.u32 (!%p189_p3), 1, %s703_s13  }
  0x32   : > { %192 = sbr.rel (%p189_p3) target bundleno = 411 (0x19b), region = 32  ;;  %s195_s19 = scalar_lea.sflag (!%p189_p3), [#allocation3], %s862_s11 }
  0x33   : > { %s531_s18 = smul.u32 (!%p189_p3), 12, %s862_s11 }
  0x35   : > { %s198_s21 = scalar_lea.vmem (!%p189_p3), [#allocation2], %s531_s18 }
  0x39   : > { %690 = dma.done.wait (%p797_p8), %s195_s19, 192  }
  0x3a   : > { %692 = vsyncadd (%p797_p8), %s195_s19, 4294967104  ;;  %v724_v0 = vmov 0.0   ;;  %vm725_vm0 = vmmov 0   ;;  %v726_v1 = vmov 0   ;;  %v238_v2 = vld [vmem:[%s198_s21] sm:$0xf] }
  0x3b   : > { %521 = vmatprep.subr.bf16.mxu1 %v724_v0  ;;  %515 = vmatprep.subr.bf16.mxu0 %v724_v0  ;;  %v242_v3 = vld [vmem:[%s198_s21 + $0x4] sm:$0x3]  ;;  %v241_v4 = vld [vmem:[%s931_s1] sm:$0xf]  ;;  %v606_v7 = vld [vmem:[%s198_s21 + $0x8] ss:$0 sps:$4 sm:$0xff]  }
  0x3c   : > { %525 = vmatprep.mubr.msk.bf16.mxu1 %vm725_vm0, %v724_v0  ;;  %517 = vmatprep.mubr.msk.bf16.mxu0 %vm725_vm0, %v724_v0  ;;  %v501_v5 = vcombine.low %v238_v2, %v242_v3  ;;  %v239_v6 = vld [vmem:[%s198_s21 + $0x4] sm:$0xf]  ;;  %vm314_vm1 = vcmask 1043456   ;;  %s727_s10 = smov 120   ;;  %v500_v10 = vcombine.low %v241_v4, %v241_v4  ;;  %s728_s22 = smov 104   ;;  %vm310_vm2 = vcmask 195584  }
  0x3d   : > { %601 = vset.pattern.permute.xlu1 %v726_v1  ;;  %602 = vset.pattern.permute.xlu0 %v726_v1  ;;  %v503_v8 = vcombine.low %v238_v2, %v239_v6  ;;  %v358_v9 = vld [vmem:[%s932_s2] sm:$0xff]  ;;  %v316_v11 = vsel %vm314_vm1, %v606_v7, 0  ;;  %vm259_vm3 = vcmask 1045504   ;;  %vm255_vm4 = vcmask 97280   ;;  %s499_s23 = sshll.u32 %s862_s11, 3  ;;  %s507_s28 = sshll.u32 %s711_s15, 7 }
  0x3e   : > { %253 = vrot.lane.b32.xlu0 %v501_v5, %s727_s10  ;;  %361 = vperm.xlu1 %601, %v358_v9   ;;  %s228_s29 = scalar_lea.vmem [#allocation5], %s499_s23  ;;  %vm365_vm5 = vcmask 523264   ;;  %s881_s8 = scalar_lea.hbm %s933_s3, %s507_s28 }
  0x3f   : > { %522 = vmatpush3.bf16.msra.mxu1 %v503_v8  ;;  %s382_s30 = sshll.u32 %s228_s29, 4  ;;  %s368_s15 = scalar_lea.sflag [#allocation4], %s862_s11  ;;  %s883_s30 = int_to_ptr.vmem [resolvable:$true] %s382_s30 }
  0x40   : > { %523 = vmatprep.subr.bf16.mxu1 %v724_v0  ;;  %s637_s18 = scalar_lea.vmem %s883_s30, 128  ;;  %p941_p9 = scmp.ne.s32.totalorder %s937_s25, 0 }
  0x41   : > { %p638_p8 = scmp.ne.s32.totalorder %s883_s30, %s637_s18  ;;  %s729_s19 = smov [#allocation5]  }
  0x42   : > { %246 = vrot.lane.b32.xlu0 %v500_v10, %s728_s22  ;;  %s641_s21 = sshll.u32 %s729_s19, 4  ;;  %s642_s21 = int_to_ptr.vmem [resolvable:$false] %s641_s21 }
  0x43   : > { %524 = vmatpush3.bf16.msra.mxu1 %v316_v11  ;;  %p639_p11 = pnand %p638_p8, %p941_p9  ;;  %s643_s4 = scalar_lea.vmem %s642_s21, 256 }
  0x44   : > { %p644_p5 = scmp.lt.s32.totalorder %s883_s30, %s642_s21  ;;  %p645_p13 = scmp.lt.s32.totalorder %s643_s4, %s637_s18 }
  0x45   : > { %p640_p0 = pneg %p639_p11 }
  0x46   : > { %526 = vmatmul.mubr.msk.bf16.vlgmr.msra.gmra.mrb[0].mxu1 %vm310_vm2, %v241_v4  ;;  %p646_p2 = por %p645_p13, %p644_p5 }
  0x48   : > { %p647_p4 = pnand %p646_p2, %p640_p0 }
  0xb0   : > { %v254_v12 = vpop.permute.xlu0 %253 }
  0xb1   : > { %v261_v13 = vsel %vm259_vm3, %v254_v12, 0 }
  0xb2   : > { %516 = vmatpush3.bf16.msra.mxu0 %v261_v13 }
  0xb4   : > { %v247_v14 = vpop.permute.xlu0 %246 }
  0xb5   : > { %518 = vmatmul.mubr.msk.bf16.vlgmr.msra.gmra.mrb[0].mxu0 %vm255_vm4, %v247_v14 }
  0xbd   : > { %v362_v20 = vpop.permute.xlu1 %361 }
 0x119   : > { %v352_v15 = vpop.f32.mrb[0].mxu1 }
 0x11a   : > { %v527_v16 = vpop.f32.mrb[1].mxu1 }
 0x11b   : > { %v355_v17 = vpop.f32.mrb[2].mxu1 }
 0x11c   : > { %v528_v18 = vpop.f32.mrb[3].mxu1 }
 0x188   : > { %v297_v19 = vpop.f32.mrb[0].mxu0 }
 0x189   : > { %v353_v21 = vadd.f32 %v352_v15, %v297_v19  ;;  %v519_v22 = vpop.f32.mrb[1].mxu0 }
 0x18a   : > { %v300_v23 = vpop.f32.mrb[2].mxu0 }
 0x18b   : > { %v364_v24 = vadd.f32 %v362_v20, %v353_v21  ;;  %v520_v25 = vpop.f32.mrb[3].mxu0 }
 0x18d   : > { %366 = vst.msk [vmem:[%s228_s29] sm:$0xff] %vm365_vm5, %v364_v24 }
 0x18e   : > { %650 = shalt.err (!%p647_p4)
}
 0x18f   : > { %s651_s11 = scalar_lea.hbm %s881_s8, 128  ;;  %s655_s9 = scalar_lea.hbm %s933_s3, 256 }
 0x190   : > { %p652_p6 = scmp.ne.s32.totalorder %s881_s8, %s651_s11  ;;  %p656_p12 = scmp.lt.u32.totalorder %s881_s8, %s933_s3 }
 0x191   : > { %p657_p1 = scmp.lt.u32.totalorder %s655_s9, %s651_s11  ;;  %p659_p8 = scmp.lt.u32.totalorder %s651_s11, %s881_s8 }
 0x192   : > { %p653_p7 = pnand %p652_p6, %p941_p9 }
 0x193   : > { %p658_p3 = por %p657_p1, %p656_p12 }
 0x194   : > { %p654_p10 = pneg %p653_p7 }
 0x195   : > { %p660_p11 = por %p659_p8, %p658_p3 }
 0x197   : > { %p661_p0 = pnand %p660_p11, %p654_p10 }
 0x199   : > { %664 = shalt.err (!%p661_p0)
}
 0x19a   : > { %534 = dma.vmem_to_hbm [thread:$0]  (%p941_p9), %s883_s30, 128, %s881_s8, %s368_s15  }
 0x19b PF: > { %s394_s23 = sand.u32 1, %s699_s12   ;;  %p942_p5 = scmp.ne.s32.totalorder %s938_s27, 0 }
 0x19c   : > { %p943_p13 = scmp.ge.s32.totalorder %s719_s17, 2  ;;  %s395_s28 = scalar_lea.sflag [#allocation4], %s394_s23 }
 0x19e   : > { %p541_p2 = pnand %p943_p13, %p942_p5 }
 0x1a0   : > { %694 = dma.done.wait (!%p541_p2), %s395_s28, 128  }
 0x1a1   : > { %696 = vsyncadd (!%p541_p2), %s395_s28, 4294967168  ;;  %s19_s17 = sadd.s32 1, %s719_s17   ;;  %s944_s12 = smov %s703_s13 }
 0x1a2   : > { %p16_p4 = scmp.ge.s32.totalorder %s19_s17, 4   ;;  %s945_s13 = smov %s707_s14 }
 0x1a3   : > { %s946_s14 = smov %s806_s26  ;;  %s947_s15 = smov %s715_s16 }
 0x1a4   : > { %s948_s16 = smov %s950_s20  ;;  %18 = sbr.rel (!%p16_p4) target bundleno = 6 (0x6), region = 83 }
 0x1ab   :  { %400 = vsyncpa [#allocation3], 1 }
 0x1ac   :  { %402 = vsyncpa [#allocation3 + $0x1], 1 }
 0x1ad   :  { %403 = vsyncpa [#allocation4], 1 }
 0x1ae   :  { %405 = vsyncpa [#allocation4 + $0x1], 1 }

</bundles_post_ra>
